<compile_context>
chip_gen: v7x
topology: tpu7x:2x2x1
jax: 0.10.0
libtpu: 0.0.40
codegen_flags: <defaults>
</compile_context>

<pallas_src>
import math
import functools

import jax
import jax.numpy as jnp
import numpy as np
from jax.experimental import pallas as pl
from jax.experimental.pallas import tpu as pltpu

_NEG_BIG = -1e30  # finite stand-in for -inf: keeps max()/exp() NaN-free.


def _attend_tile(q, lang_block, wkT, qbias, lkeep, compute_dtype):
    """Per (batch-block, L-tile) math.

    q          : (Bb, N, dm)  query projection, compute dtype, scale pre-folded
    lang_block : (Bb, tL, D2) language features for this L tile, compute dtype
    wkT        : (D2, dm)     pre-transposed key projection, compute dtype
    qbias      : (Bb, N, 1)   0.0 = keep query row, -1e30 = masked (additive)
    lkeep      : (Bb, 1, tL)  1.0 = valid language token, 0.0 = padding
    returns    : (Bb, 1, N)   f32 partial ref_scores for this L tile
    """
    bb, tl, d2 = lang_block.shape
    n = q.shape[1]

    # K projection for this L tile: bf16 operands, f32 MXU accumulation.
    # For Bb == 1 the reshapes are free squeezes.
    k = jnp.dot(lang_block.reshape(bb * tl, d2), wkT,
                preferred_element_type=jnp.float32)
    k = k.astype(compute_dtype).reshape(bb, tl, -1)             # (Bb, tL, dm)

    # scores[b,n,l] = <Q[b,n], K[b,l]>   (1/sqrt(d_model) folded into Wq^T).
    s = jax.lax.dot_general(
        q, k, dimension_numbers=(((2,), (2,)), ((0,), (0,))),
        preferred_element_type=jnp.float32)                     # (Bb, N, tL) f32

    # Additive query mask BEFORE max/exp: masked rows drop to ~-1e30, so the
    # per-column max is over kept rows only and masked rows contribute exactly
    # 0 to numerator and denominator — equivalent to masked_fill(-inf) +
    # softmax over N, without underflowing the kept exps and without a final
    # keep-mask multiply.
    s = s + qbias
    m = jnp.max(s, axis=1, keepdims=True)                       # (Bb, 1, tL)
    e = jnp.exp(s - m)                                          # (Bb, N, tL) f32
    # Note: for very large (N, tL) tiles, casting e to bf16 here would halve
    # spill traffic (keep f32 accumulation); kept in f32 for accuracy and v5e.

    # Softmax denominator + language-weighted row sum as VPU/XLU reductions
    # (NOT M=1 MXU matvecs, which would stationary-load e into the MXU).
    denom = jnp.sum(e, axis=1, keepdims=True)                   # (Bb, 1, tL), >= 1
    colscale = lkeep * pl.reciprocal(denom, approx=True)        # EUP slot
    contrib = jnp.sum(e * colscale, axis=2)                     # (Bb, N)
    return contrib.reshape(bb, 1, n)                            # lane-dense


def _fused_kernel(pc_ref, lang_ref, wqTs_ref, wkT_ref, qbias_ref, lkeep_ref,
                  out_ref, *, compute_dtype):
    """num_l == 1: both projections + scores + softmax + reduction per batch block."""
    bb, n, d1 = pc_ref.shape
    q = jnp.dot(pc_ref[...].reshape(bb * n, d1), wqTs_ref[...],
                preferred_element_type=jnp.float32)
    q = q.astype(compute_dtype).reshape(bb, n, -1)
    out_ref[...] = _attend_tile(q, lang_ref[...], wkT_ref[...], qbias_ref[...],
                                lkeep_ref[...], compute_dtype)


def _tiled_kernel(q_ref, lang_ref, wkT_ref, qbias_ref, lkeep_ref, out_ref, *,
                  compute_dtype):
    """num_l > 1: Q precomputed in the wrapper; resident (Bb,1,N) accumulator over L."""
    @pl.when(pl.program_id(1) == 0)
    def _init():
        out_ref[...] = jnp.zeros_like(out_ref)

    out_ref[...] += _attend_tile(q_ref[...], lang_ref[...], wkT_ref[...],
                                 qbias_ref[...], lkeep_ref[...], compute_dtype)


def sampling_ref_scores(pc_feat, lang_feat, wq, wk, pc_mask=None, lang_mask=None,
                        *, b_block=1, l_tile=None, use_bf16_matmul=True,
                        vmem_limit_bytes=None):
    """ref_scores of SamplingModule: (softmax_N(QK^T/sqrt(d)) * ~lang_mask).sum(-1).

    pc_feat: (B, N, D1) f32, lang_feat: (B, L, D2) f32
    wq: (d_model, D1), wk: (d_model, D2)  -- PyTorch nn.Linear layout
    pc_mask: (B, N) bool (True = masked query row) or None
    lang_mask: (B, L) bool (True = pad) or None
    returns: (B, N) f32

    Precondition (same as the PyTorch module): at least one unmasked pc row per
    batch element, otherwise the softmax over N is degenerate.

    Chip tuning notes:
      v6e/v5e (128 MiB VMEM): keep l_tile = L (fully fused path) and raise
        vmem_limit_bytes if needed; larger tiles amortize the ~0.35 us/step cost.
      v7x (64 MiB VMEM, 2 TCs): cap l_tile (e.g. 256) and set vmem_limit_bytes
        from a budget; keep b_block = 1 so num_b >= 2 feeds both TensorCores.
    """
    B, N, D1 = pc_feat.shape
    Bk, L, D2 = lang_feat.shape
    assert Bk == B
    d_model = wq.shape[0]
    assert wq.shape == (d_model, D1) and wk.shape == (d_model, D2)

    compute_dtype = jnp.bfloat16 if use_bf16_matmul else jnp.float32

    # Additive query mask in sublane layout (B, N, 1): 0 keep, -1e30 masked.
    if pc_mask is None:
        qbias = jnp.zeros((B, N, 1), jnp.float32)
    else:
        qbias = jnp.where(pc_mask.astype(bool), jnp.float32(_NEG_BIG),
                          jnp.float32(0.0)).reshape(B, N, 1)
    # Language keep-mask, lane-dense (B, 1, L).
    if lang_mask is None:
        lkeep = jnp.ones((B, 1, L), jnp.float32)
    else:
        lkeep = jnp.logical_not(lang_mask.astype(bool)).astype(jnp.float32) \
                   .reshape(B, 1, L)

    # Pre-transpose the PyTorch-layout weights once on the host and fold the
    # 1/sqrt(d_model) scale into Wq^T (removes a (Bb,N,tL) VPU multiply/tile).
    scale = 1.0 / math.sqrt(d_model)
    wqTs = (wq.T * scale).astype(compute_dtype)     # (D1, d_model), pre-scaled
    wkT = wk.T.astype(compute_dtype)                # (D2, d_model)
    pc_in = pc_feat.astype(compute_dtype)
    lang_in = lang_feat.astype(compute_dtype)

    # Tiling: b_block batch elements per grid step; L tiles are independent
    # (softmax is over N), only the (Bb, 1, N) accumulator is carried over l.
    assert B % b_block == 0
    if l_tile is None or l_tile >= L:
        l_tile = L
    assert L % l_tile == 0 and (l_tile == L or l_tile % 128 == 0), (
        "l_tile must equal L or be a multiple of 128 (lane/sublane alignment)")
    if b_block > 1:
        assert N % 8 == 0 and l_tile % 8 == 0, "folded reshapes need 8-aligned dims"
    num_b = B // b_block
    num_l = L // l_tile
    # TODO(synk): when B == 1 on v7x, split the L axis across the 2 TensorCores
    # via per-core partial outputs; the "parallel" b axis alone can't feed both.

    itemsize = jnp.dtype(compute_dtype).itemsize
    flops = 2 * B * (N * D1 + L * D2 + N * L) * d_model + 5 * B * N * L
    cost = pl.CostEstimate(
        flops=int(flops),
        transcendentals=int(B * N * L + B * L),
        bytes_accessed=int(itemsize * (B * (N * D1 + L * D2) + (D1 + D2) * d_model)
                           + 4 * B * (N + L) + 4 * B * N))

    if num_l == 1:
        # Fully fused path (default): one grid step per batch block, 1-D grid.
        kernel = functools.partial(_fused_kernel, compute_dtype=compute_dtype)
        out = pl.pallas_call(
            kernel,
            out_shape=jax.ShapeDtypeStruct((B, 1, N), jnp.float32),
            grid_spec=pltpu.PrefetchScalarGridSpec(
                num_scalar_prefetch=0,
                grid=(num_b,),
                in_specs=[
                    pl.BlockSpec((b_block, N, D1), lambda b: (b, 0, 0)),       # pc_feat
                    pl.BlockSpec((b_block, L, D2), lambda b: (b, 0, 0)),       # lang_feat
                    pl.BlockSpec((D1, d_model), lambda b: (0, 0)),             # Wq^T * scale
                    pl.BlockSpec((D2, d_model), lambda b: (0, 0)),             # Wk^T
                    pl.BlockSpec((b_block, N, 1), lambda b: (b, 0, 0)),        # query bias
                    pl.BlockSpec((b_block, 1, L), lambda b: (b, 0, 0)),        # lang keep
                ],
                out_specs=pl.BlockSpec((b_block, 1, N), lambda b: (b, 0, 0)),  # lane-dense
            ),
            compiler_params=pltpu.CompilerParams(
                dimension_semantics=("parallel",),
                vmem_limit_bytes=vmem_limit_bytes),
            cost_estimate=cost,
        )(pc_in, lang_in, wqTs, wkT, qbias, lkeep)
    else:
        # L-tiled path: Q projection hoisted to a single XLA bf16 matmul so the
        # l==0 grid step carries no extra work (no pipeline bubble, no resident
        # q_scratch VMEM); the kernel reduces L tiles into a resident accumulator.
        q = jnp.einsum('bnd,dm->bnm', pc_in, wqTs,
                       preferred_element_type=jnp.float32).astype(compute_dtype)
        kernel = functools.partial(_tiled_kernel, compute_dtype=compute_dtype)
        out = pl.pallas_call(
            kernel,
            out_shape=jax.ShapeDtypeStruct((B, 1, N), jnp.float32),
            grid_spec=pltpu.PrefetchScalarGridSpec(
                num_scalar_prefetch=0,
                grid=(num_b, num_l),                                   # L (reduction) last
                in_specs=[
                    pl.BlockSpec((b_block, N, d_model), lambda b, l: (b, 0, 0)),   # Q
                    pl.BlockSpec((b_block, l_tile, D2), lambda b, l: (b, l, 0)),   # lang
                    pl.BlockSpec((D2, d_model), lambda b, l: (0, 0)),              # Wk^T
                    pl.BlockSpec((b_block, N, 1), lambda b, l: (b, 0, 0)),         # q bias
                    pl.BlockSpec((b_block, 1, l_tile), lambda b, l: (b, 0, l)),    # l keep
                ],
                out_specs=pl.BlockSpec((b_block, 1, N), lambda b, l: (b, 0, 0)),
            ),
            compiler_params=pltpu.CompilerParams(
                dimension_semantics=("parallel", "arbitrary"),
                vmem_limit_bytes=vmem_limit_bytes),
            cost_estimate=cost,
        )(q, lang_in, wkT, qbias, lkeep)
    return out.reshape(B, N)


def sampling_module_forward(pc_feat, lang_feat, pc_mask, lang_mask, wq, wk,
                            num_proposal, gate=None, **pallas_kwargs):
    """Full SamplingModule.forward: returns (sample_inds, ref_scores)."""
    ref_scores = sampling_ref_scores(pc_feat, lang_feat, wq, wk,
                                     pc_mask=pc_mask, lang_mask=lang_mask,
                                     **pallas_kwargs)
    if gate is not None:
        ref_scores = ref_scores * gate
    B, N = ref_scores.shape
    if N < num_proposal:
        sample_inds = jnp.broadcast_to(jnp.arange(N, dtype=jnp.int32)[None, :], (B, N))
    else:
        # TODO(synk): top-k has no clean Pallas TPU primitive; use XLA's lax.top_k.
        sample_inds = jax.lax.top_k(ref_scores, num_proposal)[1].astype(jnp.int32)
    return sample_inds, ref_scores


def _reference_forward(pc_feat, lang_feat, pc_mask, lang_mask, wq, wk,
                       num_proposal, gate=None):
    """Pure-JAX (f32) mirror of the PyTorch SamplingModule.forward."""
    d_model = wq.shape[0]
    Q = jnp.einsum("bnd,md->bnm", pc_feat, wq)
    K = jnp.einsum("bld,md->blm", lang_feat, wk)
    scores = jnp.einsum("bnm,blm->bnl", Q, K) / math.sqrt(d_model)
    if pc_mask is not None:
        scores = jnp.where(pc_mask.astype(bool)[:, :, None], -jnp.inf, scores)
    attn = jax.nn.softmax(scores, axis=1)
    if lang_mask is None:
        lkeep = jnp.ones(lang_feat.shape[:2], jnp.float32)
    else:
        lkeep = jnp.logical_not(lang_mask.astype(bool)).astype(jnp.float32)
    ref_scores = (attn * lkeep[:, None, :]).sum(-1)
    if gate is not None:
        ref_scores = ref_scores * gate
    B, N = ref_scores.shape
    if N < num_proposal:
        sample_inds = jnp.broadcast_to(jnp.arange(N, dtype=jnp.int32)[None, :], (B, N))
    else:
        sample_inds = jax.lax.top_k(ref_scores, num_proposal)[1].astype(jnp.int32)
    return sample_inds, ref_scores


if __name__ == "__main__":
    root = jax.random.PRNGKey(0)
    k_pc, k_lang, k_wq, k_wk, k_m1, k_m2 = jax.random.split(root, 6)

    # Small shapes consistent with the module.
    B, N, L = 2, 32, 8                 # batch, num pc tokens, num lang tokens
    pc_dim, lang_dim, d_model = 16, 24, 32
    num_proposal = 16

    pc_feat = jax.random.normal(k_pc, (B, N, pc_dim), dtype=jnp.float32)
    lang_feat = jax.random.normal(k_lang, (B, L, lang_dim), dtype=jnp.float32)

    # nn.Linear(bias=False) default init: U(-1/sqrt(fan_in), +1/sqrt(fan_in)).
    wq = jax.random.uniform(k_wq, (d_model, pc_dim), dtype=jnp.float32,
                            minval=-1.0 / math.sqrt(pc_dim),
                            maxval=1.0 / math.sqrt(pc_dim))
    wk = jax.random.uniform(k_wk, (d_model, lang_dim), dtype=jnp.float32,
                            minval=-1.0 / math.sqrt(lang_dim),
                            maxval=1.0 / math.sqrt(lang_dim))

    # Masks: True = masked. At least one unmasked pc row per batch element so the
    # softmax over N stays well-defined (as in practice).
    pc_mask = jax.random.bernoulli(k_m1, p=0.25, shape=(B, N)).at[:, 0].set(False)
    lang_mask = jax.random.bernoulli(k_m2, p=0.25, shape=(B, L))

    ref_inds, ref_scores_ref = _reference_forward(
        pc_feat, lang_feat, pc_mask, lang_mask, wq, wk, num_proposal)

    # (1) f32 MXU path: tight check of the fused math (approx EUP reciprocal ~1e-3).
    _, scores_f32 = sampling_module_forward(
        pc_feat, lang_feat, pc_mask, lang_mask, wq, wk, num_proposal,
        use_bf16_matmul=False)
    scores_f32 = jax.block_until_ready(scores_f32)
    np.testing.assert_allclose(np.asarray(scores_f32), np.asarray(ref_scores_ref),
                               atol=5e-3, rtol=5e-3)

    # (2) default bf16 path (bf16 MXU operands, f32 accumulation): looser tolerance.
    sample_inds, ref_scores = sampling_module_forward(
        pc_feat, lang_feat, pc_mask, lang_mask, wq, wk, num_proposal)
    ref_scores = jax.block_until_ready(ref_scores)
    np.testing.assert_allclose(np.asarray(ref_scores), np.asarray(ref_scores_ref),
                               atol=3e-2, rtol=3e-2)
    # Compare top-k *values* (indices may legitimately differ on near-ties).
    topv_kernel = jnp.take_along_axis(ref_scores, sample_inds, axis=1)
    topv_ref = jnp.take_along_axis(ref_scores_ref, ref_inds, axis=1)
    np.testing.assert_allclose(np.asarray(topv_kernel), np.asarray(topv_ref),
                               atol=3e-2, rtol=3e-2)
    assert sample_inds.shape == (B, num_proposal)

    # (3) pc_mask=None path.
    _, scores_nm = sampling_module_forward(
        pc_feat, lang_feat, None, lang_mask, wq, wk, num_proposal)
    scores_nm = jax.block_until_ready(scores_nm)
    _, scores_nm_ref = _reference_forward(
        pc_feat, lang_feat, None, lang_mask, wq, wk, num_proposal)
    np.testing.assert_allclose(np.asarray(scores_nm), np.asarray(scores_nm_ref),
                               atol=3e-2, rtol=3e-2)

    # (4) L-tiled path (num_l > 1): hoisted Q, resident accumulator over L tiles.
    B2, N2, L2 = 2, 64, 256
    k_pc2, k_lang2, k_m3, k_m4 = jax.random.split(jax.random.PRNGKey(1), 4)
    pc2 = jax.random.normal(k_pc2, (B2, N2, pc_dim), dtype=jnp.float32)
    lang2 = jax.random.normal(k_lang2, (B2, L2, lang_dim), dtype=jnp.float32)
    m_pc2 = jax.random.bernoulli(k_m3, p=0.25, shape=(B2, N2)).at[:, 0].set(False)
    m_lang2 = jax.random.bernoulli(k_m4, p=0.25, shape=(B2, L2))
    scores_t = sampling_ref_scores(pc2, lang2, wq, wk, pc_mask=m_pc2,
                                   lang_mask=m_lang2, l_tile=128)
    scores_t = jax.block_until_ready(scores_t)
    _, scores_t_ref = _reference_forward(pc2, lang2, m_pc2, m_lang2, wq, wk,
                                         num_proposal)
    np.testing.assert_allclose(np.asarray(scores_t), np.asarray(scores_t_ref),
                               atol=3e-2, rtol=3e-2)

    print("KERNEL_OK")
</pallas_src>

<mosaic_0001>
module attributes {stable_mosaic.version = 11 : i64} {
  func.func @_fused_kernel(%arg0: i32, %arg1: memref<1x32x16xf32, #tpu.memory_space<vmem>>, %arg2: memref<1x8x24xf32, #tpu.memory_space<vmem>>, %arg3: memref<16x32xf32, #tpu.memory_space<vmem>>, %arg4: memref<24x32xf32, #tpu.memory_space<vmem>>, %arg5: memref<1x32x1xf32, #tpu.memory_space<vmem>>, %arg6: memref<1x1x8xf32, #tpu.memory_space<vmem>>, %arg7: memref<1x1x32xf32, #tpu.memory_space<vmem>>) attributes {dimension_semantics = [#tpu.dimension_semantics<parallel>], iteration_bounds = array<i64: 2>, scalar_prefetch = 0 : i64, scratch_operands = 0 : i64, tpu.core_type = #tpu.core_type<tc>, window_params = [{transform_indices = @transform_0, window_bounds = array<i64: 1, 32, 16>}, {transform_indices = @transform_1, window_bounds = array<i64: 1, 8, 24>}, {pipeline_mode = #tpu.pipeline_mode<synchronous>, transform_indices = @transform_2, window_bounds = array<i64: 16, 32>}, {pipeline_mode = #tpu.pipeline_mode<synchronous>, transform_indices = @transform_3, window_bounds = array<i64: 24, 32>}, {transform_indices = @transform_4, window_bounds = array<i64: 1, 32, 1>}, {transform_indices = @transform_5, window_bounds = array<i64: 1, 1, 8>}, {transform_indices = @transform_6, window_bounds = array<i64: 1, 1, 32>}]} {
    %c0 = arith.constant 0 : index
    %c0_0 = arith.constant 0 : index
    %c0_1 = arith.constant 0 : index
    %0 = vector.load %arg1[%c0, %c0_0, %c0_1] : memref<1x32x16xf32, #tpu.memory_space<vmem>>, vector<1x32x16xf32>
    %1 = vector.shape_cast %0 : vector<1x32x16xf32> to vector<32x16xf32>
    %c0_2 = arith.constant 0 : index
    %c0_3 = arith.constant 0 : index
    %2 = vector.load %arg3[%c0_2, %c0_3] : memref<16x32xf32, #tpu.memory_space<vmem>>, vector<16x32xf32>
    %cst = arith.constant dense<0.000000e+00> : vector<32x32xf32>
    %3 = tpu.matmul %1, %2, %cst {dimension_numbers = #tpu.dot_dimension_numbers<[1], [0], [0], [1], [0, 0, 1, 1], [], []>} : vector<32x16xf32>, vector<16x32xf32>, vector<32x32xf32> -> vector<32x32xf32>
    %4 = vector.shape_cast %3 : vector<32x32xf32> to vector<1x32x32xf32>
    %c0_4 = arith.constant 0 : index
    %c0_5 = arith.constant 0 : index
    %c0_6 = arith.constant 0 : index
    %5 = vector.load %arg2[%c0_4, %c0_5, %c0_6] : memref<1x8x24xf32, #tpu.memory_space<vmem>>, vector<1x8x24xf32>
    %c0_7 = arith.constant 0 : index
    %c0_8 = arith.constant 0 : index
    %6 = vector.load %arg4[%c0_7, %c0_8] : memref<24x32xf32, #tpu.memory_space<vmem>>, vector<24x32xf32>
    %c0_9 = arith.constant 0 : index
    %c0_10 = arith.constant 0 : index
    %c0_11 = arith.constant 0 : index
    %7 = vector.load %arg5[%c0_9, %c0_10, %c0_11] : memref<1x32x1xf32, #tpu.memory_space<vmem>>, vector<1x32x1xf32>
    %c0_12 = arith.constant 0 : index
    %c0_13 = arith.constant 0 : index
    %c0_14 = arith.constant 0 : index
    %8 = vector.load %arg6[%c0_12, %c0_13, %c0_14] : memref<1x1x8xf32, #tpu.memory_space<vmem>>, vector<1x1x8xf32>
    %9 = vector.shape_cast %5 : vector<1x8x24xf32> to vector<8x24xf32>
    %cst_15 = arith.constant dense<0.000000e+00> : vector<8x32xf32>
    %10 = tpu.matmul %9, %6, %cst_15 {dimension_numbers = #tpu.dot_dimension_numbers<[1], [0], [0], [1], [0, 0, 1, 1], [], []>} : vector<8x24xf32>, vector<24x32xf32>, vector<8x32xf32> -> vector<8x32xf32>
    %11 = vector.shape_cast %10 : vector<8x32xf32> to vector<1x8x32xf32>
    %cst_16 = arith.constant dense<0.000000e+00> : vector<1x32x8xf32>
    %12 = tpu.matmul %4, %11, %cst_16 {dimension_numbers = #tpu.dot_dimension_numbers<[2], [2], [1], [1], [0, 0, 0, 1, 1, 1], [0], [0]>} : vector<1x32x32xf32>, vector<1x8x32xf32>, vector<1x32x8xf32> -> vector<1x32x8xf32>
    %13 = vector.broadcast %7 : vector<1x32x1xf32> to vector<1x32x8xf32>
    %14 = arith.addf %12, %13 : vector<1x32x8xf32>
    %cst_17 = arith.constant dense<0xFF800000> : vector<1x8xf32>
    %15 = vector.multi_reduction <maximumf>, %14, %cst_17 [1] : vector<1x32x8xf32> to vector<1x8xf32>
    %16 = vector.shape_cast %15 : vector<1x8xf32> to vector<1x1x8xf32>
    %17 = vector.broadcast %16 : vector<1x1x8xf32> to vector<1x32x8xf32>
    %18 = arith.subf %14, %17 : vector<1x32x8xf32>
    %19 = math.exp %18 : vector<1x32x8xf32>
    %cst_18 = arith.constant dense<0.000000e+00> : vector<1x8xf32>
    %20 = vector.multi_reduction <add>, %19, %cst_18 [1] : vector<1x32x8xf32> to vector<1x8xf32>
    %21 = vector.shape_cast %20 : vector<1x8xf32> to vector<1x1x8xf32>
    %22 = tpu.reciprocal %21 {approx = true} : vector<1x1x8xf32> -> vector<1x1x8xf32>
    %23 = arith.mulf %8, %22 : vector<1x1x8xf32>
    %24 = vector.broadcast %23 : vector<1x1x8xf32> to vector<1x32x8xf32>
    %25 = arith.mulf %19, %24 : vector<1x32x8xf32>
    %cst_19 = arith.constant dense<0.000000e+00> : vector<1x32xf32>
    %26 = vector.multi_reduction <add>, %25, %cst_19 [2] : vector<1x32x8xf32> to vector<1x32xf32>
    %27 = vector.shape_cast %26 : vector<1x32xf32> to vector<1x1x32xf32>
    %c0_20 = arith.constant 0 : index
    %c0_21 = arith.constant 0 : index
    %c0_22 = arith.constant 0 : index
    %28 = vector.load %arg7[%c0_20, %c0_21, %c0_22] : memref<1x1x32xf32, #tpu.memory_space<vmem>>, vector<1x1x32xf32>
    tpu.vector_store %arg7[%c0_20, %c0_21, %c0_22], %27 {strides = array<i32>} : memref<1x1x32xf32, #tpu.memory_space<vmem>>, vector<1x1x32xf32>,
    return
  }
  func.func @transform_0(%arg0: i32) -> (i32, i32, i32) {
    %c0_i32 = arith.constant 0 : i32
    %c0_i32_0 = arith.constant 0 : i32
    %c0_i32_1 = arith.constant 0 : i32
    return %arg0, %c0_i32, %c0_i32_0 : i32, i32, i32
  }
  func.func @transform_1(%arg0: i32) -> (i32, i32, i32) {
    %c0_i32 = arith.constant 0 : i32
    %c0_i32_0 = arith.constant 0 : i32
    %c0_i32_1 = arith.constant 0 : i32
    return %arg0, %c0_i32, %c0_i32_0 : i32, i32, i32
  }
  func.func @transform_2(%arg0: i32) -> (i32, i32) {
    %c0_i32 = arith.constant 0 : i32
    %c0_i32_0 = arith.constant 0 : i32
    %c0_i32_1 = arith.constant 0 : i32
    return %c0_i32, %c0_i32_0 : i32, i32
  }
  func.func @transform_3(%arg0: i32) -> (i32, i32) {
    %c0_i32 = arith.constant 0 : i32
    %c0_i32_0 = arith.constant 0 : i32
    %c0_i32_1 = arith.constant 0 : i32
    return %c0_i32, %c0_i32_0 : i32, i32
  }
  func.func @transform_4(%arg0: i32) -> (i32, i32, i32) {
    %c0_i32 = arith.constant 0 : i32
    %c0_i32_0 = arith.constant 0 : i32
    %c0_i32_1 = arith.constant 0 : i32
    return %arg0, %c0_i32, %c0_i32_0 : i32, i32, i32
  }
  func.func @transform_5(%arg0: i32) -> (i32, i32, i32) {
    %c0_i32 = arith.constant 0 : i32
    %c0_i32_0 = arith.constant 0 : i32
    %c0_i32_1 = arith.constant 0 : i32
    return %arg0, %c0_i32, %c0_i32_0 : i32, i32, i32
  }
  func.func @transform_6(%arg0: i32) -> (i32, i32, i32) {
    %c0_i32 = arith.constant 0 : i32
    %c0_i32_0 = arith.constant 0 : i32
    %c0_i32_1 = arith.constant 0 : i32
    return %arg0, %c0_i32, %c0_i32_0 : i32, i32, i32
  }
}

</mosaic_0001>

<bundles_post_ra>
// kernel: tpu_custom_call.1
= control target key start
LH: loop header
LB: loop body
LE: loop exit
PB: predicated region body
PF: predicated region fallthrough
CT: control target
= control target key end

     0   :  { %11 = vsyncpa [#allocation3], 0  ;;  %s1183_s0 = inlined_call_operand.vmem [shape: f32[2,32,16], index: 0, kind: input, shape index: {}]   ;;  %s1184_s1 = inlined_call_operand.vmem [shape: f32[2,8,24], index: 1, kind: input, shape index: {}]   ;;  %s1185_s2 = inlined_call_operand.vmem [shape: f32[16,32], index: 2, kind: input, shape index: {}]   ;;  %s1186_s3 = inlined_call_operand.vmem [shape: f32[24,32], index: 3, kind: input, shape index: {}]   ;;  %s1187_s4 = inlined_call_operand.vmem [shape: f32[2,32,1], index: 4, kind: input, shape index: {}]   ;;  %s1188_s5 = inlined_call_operand.vmem [shape: f32[2,1,8], index: 5, kind: input, shape index: {}]   ;;  %s1189_s6 = inlined_call_operand.hbm [shape: f32[2,1,32], index: 6, kind: output, shape index: {}]  }
   0x1   :  { %13 = vsyncpa [#allocation3 + $0x1], 0  ;;  %s1038_s21 = smov 0   ;;  %s1040_s22 = smov 0  }
   0x2   :  { %s1042_s23 = smov 0   ;;  %s1044_s24 = smov 0  }
   0x3 LB: > { %s1059_s25 = sadd.s32 4294967295, %s996_s24   ;;  %s806_s26 = sadd.s32 4294967294, %s996_s24   ;;  %s996_s24 = sphi %s1044_s24, %s1195_s24   ;;  %s992_s23 = sphi %s1042_s23, %s1194_s23   ;;  %s988_s22 = sphi %s1040_s22, %s1193_s22   ;;  %s984_s21 = sphi %s1038_s21, %s1192_s21  }
   0x4   : > { %s1063_s27 = sadd.s32 1, %s996_s24   ;;  %s172_s28 = sadd.s32 1, %s992_s23 }
   0x5   : > { %s169_s29 = ssub.s32 %s996_s24, %s1063_s27  ;;  %p182_p0 = scmp.ne.s32.totalorder %s992_s23, %s988_s22 }
   0x6   : > { %p170_p1 = scmp.eq.s32.totalorder %s169_s29, 0  ;;  %p183_p2 = scmp.eq.s32.totalorder %s1059_s25, 1 }
   0x7   : > { %p188_p3 = scmp.ne.s32.totalorder %s988_s22, %s984_s21  ;;  %p189_p4 = scmp.eq.s32.totalorder %s806_s26, 1 }
   0x8   : > { %s1074_s30 = scalar_select %p170_p1, %s992_s23, %s172_s28  }
   0x9   : > { %p1076_p5 = por %p183_p2, %p182_p0  ;;  %p1080_p6 = por %p189_p4, %p188_p3 }
   0xa   : > { %p809_p7 = scmp.ge.s32.totalorder %s996_s24, 1  ;;  %p242_p8 = scmp.lt.s32.totalorder %s996_s24, 3 }
   0xc   : > { %p243_p9 = pnand %p809_p7, %p242_p8 }
   0xd   : > { %v304_v0 = vld [vmem:[%s1185_s2] sm:$0xff] (!%p243_p9)  ;;  %v305_v1 = vld [vmem:[%s1185_s2 + $0x8] sm:$0xff] (!%p243_p9)  ;;  %p283_p10 = scmp.lt.s32.totalorder (!%p243_p9), %s1059_s25, 1  ;;  %vm306_vm0 = vcmask (!%p243_p9), 130048   ;;  %v998_v5 = vmov (!%p243_p9), 0.0|0.0   ;;  %v999_v11 = vmov (!%p243_p9), 0.0  }
   0xe   : > { %246 = sbr.rel (%p243_p9) target bundleno = 708 (0x2c4), region = 44  ;;  %v872_v2 = vpack.c.bf16 (!%p243_p9), %v305_v1, %v304_v0  ;;  %v405_v3 = vld [vmem:[%s1186_s3] sm:$0xff] (!%p243_p9)  ;;  %v406_v4 = vld [vmem:[%s1186_s3 + $0x8] sm:$0xff] (!%p243_p9)  ;;  %v407_v12 = vld [vmem:[%s1186_s3 + $0x10] sm:$0xff] (!%p243_p9)  ;;  %vm1000_vm1 = vmmov (!%p243_p9), 0   ;;  %vm413_vm2 = vcmask (!%p243_p9), 195584  }
   0xf   : > { %v877_v6 = vpack.c.bf16 (!%p243_p9), %v406_v4, %v405_v3  ;;  %v1001_v14 = vmov (!%p243_p9), 0   ;;  %vm507_vm3 = vcmask (!%p243_p9), 261120   ;;  %vm608_vm4 = vcmask (!%p243_p9), 64512   ;;  %s825_s20 = sshll.u32 (!%p243_p9), %s1059_s25, 4 }
  0x10   : > { %873 = vmatprep.subr.bf16.mxu0 (!%p243_p9), %v872_v2  ;;  %922 = vset.pattern.permute.xlu0 (!%p243_p9), %v1001_v14  ;;  %vm686_vm5 = vcmask (!%p243_p9), 130112   ;;  %vm693_vm6 = vcmask (!%p243_p9), 195712   ;;  %vm700_vm7 = vcmask (!%p243_p9), 261312   ;;  %vm703_vm8 = vcmask (!%p243_p9), 253952   ;;  %s1141_s10 = scalar_lea.hbm (!%p243_p9), %s1189_s6, %s825_s20 }
  0x11   : > { %875 = vmatpush3.bf16.msra.mxu0 (!%p243_p9), %v872_v2  ;;  %923 = vset.pattern.permute.xlu1 (!%p243_p9), %v1001_v14 }
  0x12   : > { %876 = vmatprep.subr.bf16.mxu0 (!%p243_p9), %v998_v5 }
  0x15   : > { %s1094_s13 = scalar_select %p283_p10, %s1059_s25, 1 }
  0x17   : > { %s828_s18 = sshll.u32 %s1094_s13, 5  ;;  %s812_s28 = sshll.u32 %s1094_s13, 3 }
  0x18   : > { %s287_s26 = scalar_lea.vmem %s1183_s0, %s828_s18  ;;  %s291_s12 = scalar_lea.vmem %s1184_s1, %s812_s28 }
  0x19   : > { %v300_v7 = vld [vmem:[%s287_s26] sm:$0xff]  ;;  %v301_v8 = vld [vmem:[%s287_s26 + $0x8] sm:$0xff]  ;;  %v302_v9 = vld [vmem:[%s287_s26 + $0x10] sm:$0xff]  ;;  %s296_s16 = scalar_lea.vmem %s1187_s4, %s828_s18  ;;  %s299_s19 = scalar_lea.vmem %s1188_s5, %s1094_s13 }
  0x1a   : > { %849 = vmatprep.mubr.msk.f32.mxu0 %vm306_vm0, %v300_v7  ;;  %v303_v10 = vld [vmem:[%s287_s26 + $0x18] sm:$0xff]  ;;  %v404_v13 = vld [vmem:[%s291_s12] sm:$0xff]  ;;  %v410_v16 = vld [vmem:[%s296_s16 + $0x10] sm:$0xff]  ;;  %s281_s13 = sand.u32 1, %s988_s22   ;;  %s1002_s12 = smov [#allocation2]  }
  0x1b   : > { %850 = vmatmul.mubr.msk.f32.vlgmr.msra.gmra.mrb[0].mxu0 %vm306_vm0, %v301_v8  ;;  %v408_v15 = vld [vmem:[%s296_s16] sm:$0xff]  ;;  %499 = vperm.xlu1 %923, %v410_v16   ;;  %v409_v17 = vld [vmem:[%s296_s16 + $0x8] sm:$0xff]  ;;  %v411_v18 = vld [vmem:[%s296_s16 + $0x18] sm:$0xff]  ;;  %s282_s26 = scalar_lea.vmem [#allocation2], %s281_s13  ;;  %s706_s25 = scalar_lea.sflag [#allocation3], %s281_s13 }
  0x1c   : > { %878 = vmatpush3.bf16.msra.mxu0 %v877_v6  ;;  %852 = vmatprep.mubr.msk.f32.mxu0 %vm306_vm0, %v302_v9  ;;  %s718_s28 = sshll.u32 %s282_s26, 4  ;;  %s938_s14 = sshll.u32 %s1002_s12, 4  ;;  %s1143_s28 = int_to_ptr.vmem [resolvable:$true] %s718_s28  ;;  %s939_s14 = int_to_ptr.vmem [resolvable:$false] %s938_s14 }
  0x1d   : > { %859 = vmatprep.subr.mxu0 %v999_v11  ;;  %489 = vperm.xlu0 %922, %v408_v15   ;;  %s934_s11 = scalar_lea.vmem %s1143_s28, 16  ;;  %s940_s15 = scalar_lea.vmem %s939_s14, 32 }
  0x1e   : > { %p935_p11 = scmp.ne.s32.totalorder %s1143_s28, %s934_s11  ;;  %p941_p0 = scmp.lt.s32.totalorder %s1143_s28, %s939_s14 }
  0x1f   : > { %853 = vmatmul.mubr.msk.f32.gmra.mrb[2].mxu0 %vm306_vm0, %v303_v10  ;;  %504 = vperm.xlu1 %923, %v411_v18   ;;  %p942_p1 = scmp.lt.s32.totalorder %s940_s15, %s934_s11 }
  0x20   : > { %860 = vmatpush3.msra.mxu0 %v407_v12  ;;  %861 = vmatprep.mubr.msk.f32.mxu0 %vm1000_vm1, %v999_v11  ;;  %v650_v11 = vlaneseq  ;;  %p936_p12 = pnand %p935_p11, %p1076_p5 }
  0x21   : > { %494 = vperm.xlu0 %922, %v409_v17   ;;  %p943_p2 = por %p942_p1, %p941_p0 }
  0x22   : > { %v651_v12 = vshrl.u32 %v650_v11, 7  ;;  %p937_p13 = pneg %p936_p12 }
  0x23   : > { %862 = vmatmul.mubr.msk.f32.vlgmr.msra.gmra.mrb[4].mxu0 %vm413_vm2, %v404_v13  ;;  %v412_v13 = vld [vmem:[%s299_s19] sm:$0x1] }
  0x24   : > { %v652_v14 = vsub.s32 0, %v651_v12  ;;  %p944_p3 = pnand %p943_p2, %p937_p13 }
  0x9a   : > { %v500_v26 = vpop.permute.xlu1 %499 }
  0x9c   : > { %v490_v25 = vpop.permute.xlu0 %489 }
  0x9e   : > { %v505_v33 = vpop.permute.xlu1 %504 }
  0xa0   : > { %v495_v27 = vpop.permute.xlu0 %494 }
  0xee   : > { %v851_v19 = vpop.f32.mrb[0].mxu0 }
  0xef   : > { %v385_v20 = vpop.f32.mrb[1].mxu0 }
  0xf0   : > { %866 = vmatprep.mubr.msk.f32.mxu1 %vm507_vm3, %v385_v20 }
  0xf2   : > { %v854_v21 = vpop.f32.mrb[2].mxu0 }
  0xf3   : > { %v395_v22 = vpop.f32.mrb[3].mxu0 }
  0xf6   : > { %v483_v23 = vpop.f32.mrb[4].mxu0 }
  0xf7   : > { %v863_v24 = vpop.f32.mrb[5].mxu0  ;;  %864 = vmatprep.subr.msk.mxu1 %vm507_vm3, %v483_v23 }
  0xf8   : > { %865 = vmatpush3.xpose.msk.msra.mxu1 %vm507_vm3, %v483_v23 }
  0xfb   : > { %867 = vmatmul.mubr.msk.f32.vlgmr.msra.gmra.mrb[0].mxu1 %vm507_vm3, %v851_v19 }
  0xfc   : > { %869 = vmatprep.mubr.msk.f32.mxu1 %vm507_vm3, %v395_v22 }
  0xff   : > { %870 = vmatmul.mubr.msk.f32.gmra.mrb[2].mxu1 %vm507_vm3, %v854_v21 }
 0x1ce   : > { %v868_v28 = vpop.f32.mrb[0].mxu1 }
 0x1cf   : > { %v595_v29 = vadd.f32 %v868_v28, %v495_v27  ;;  %v589_v30 = vpop.f32.mrb[1].mxu1 }
 0x1d0   : > { %v590_v31 = vadd.f32 %v589_v30, %v490_v25 }
 0x1d1   : > { %v610_v32 = vsel %vm608_vm4, %v595_v29, -inf }
 0x1d2   : > { %v609_v34 = vsel %vm608_vm4, %v590_v31, -inf  ;;  %v871_v35 = vpop.f32.mrb[2].mxu1 }
 0x1d3   : > { %v613_v36 = vmax.f32 %v609_v34, %v610_v32  ;;  %v605_v37 = vadd.f32 %v871_v35, %v505_v33  ;;  %v599_v38 = vpop.f32.mrb[3].mxu1 }
 0x1d4   : > { %v600_v39 = vadd.f32 %v599_v38, %v500_v26  ;;  %v676_v26 = vand.u32 127, %v650_v11 }
 0x1d5   : > { %v612_v40 = vsel %vm608_vm4, %v605_v37, -inf }
 0x1d6   : > { %v611_v41 = vsel %vm608_vm4, %v600_v39, -inf  ;;  %v681_v27 = vadd.s32 4294967288, %v676_v26  ;;  %v688_v28 = vadd.s32 4294967280, %v676_v26  ;;  %v695_v32 = vadd.s32 4294967272, %v676_v26 }
 0x1d7   : > { %v614_v42 = vmax.f32 %v611_v41, %v612_v40 }
 0x1d8   : > { %v684_v30 = vsub.s32 %v681_v27, %v651_v12  ;;  %v691_v34 = vsub.s32 %v688_v28, %v651_v12  ;;  %v698_v38 = vsub.s32 %v695_v32, %v651_v12 }
 0x1d9   : > { %v615_v43 = vmax.f32 %v613_v36, %v614_v42 }
 0x1db   : > { %v616_v44 = vrot.slane %v615_v43, 4 }
 0x1dd   : > { %v617_v45 = vmax.f32 %v615_v43, %v616_v44 }
 0x1df   : > { %v618_v46 = vrot.slane %v617_v45, 2 }
 0x1e1   : > { %v619_v47 = vmax.f32 %v617_v45, %v618_v46 }
 0x1e3   : > { %v620_v48 = vrot.slane %v619_v47, 1 }
 0x1e5   : > { %v621_v49 = vmax.f32 %v619_v47, %v620_v48 }
 0x1e7   : > { %v622_v50 = vsub.f32 %v590_v31, %v621_v49  ;;  %v624_v51 = vsub.f32 %v600_v39, %v621_v49  ;;  %v625_v52 = vsub.f32 %v605_v37, %v621_v49  ;;  %v623_v53 = vsub.f32 %v595_v29, %v621_v49 }
 0x1e8   : > { %v679_v31 = vsub.s32 %v676_v26, %v651_v12 }
 0x1e9   : > { %v626_v54 = vmul.f32 1.442695, %v622_v50  ;;  %v630_v55 = vmul.f32 1.442695, %v624_v51  ;;  %v628_v56 = vmul.f32 1.442695, %v623_v53 }
 0x1ea   : > { %v632_v57 = vmul.f32 1.442695, %v625_v52 }
 0x1eb   : > { %924 = vpow2.f32 %v626_v54 }
 0x1ec   : > { %926 = vpow2.f32 %v630_v55 }
 0x1ed   : > { %928 = vpow2.f32 %v628_v56 }
 0x1ee   : > { %930 = vpow2.f32 %v632_v57 }
 0x1f5   : > { %v925_v58 = vpop.eup %924 }
 0x1f6   : > { %v927_v59 = vpop.eup %926  ;;  %v634_v60 = vsel %vm608_vm4, %v925_v58, 0.0 }
 0x1f7   : > { %v929_v61 = vpop.eup %928  ;;  %v637_v1 = vsel %vm608_vm4, %v927_v59, 0.0 }
 0x1f8   : > { %v635_v62 = vsel %vm608_vm4, %v929_v61, 0.0  ;;  %v931_v63 = vpop.eup %930 }
 0x1f9   : > { %v636_v0 = vadd.f32 %v635_v62, %v634_v60  ;;  %v639_v3 = vsel %vm608_vm4, %v931_v63, 0.0 }
 0x1fb   : > { %v638_v2 = vadd.f32 %v637_v1, %v636_v0 }
 0x1fd   : > { %v640_v4 = vadd.f32 %v639_v3, %v638_v2 }
 0x1ff   : > { %v641_v5 = vrot.slane %v640_v4, 4 }
 0x201   : > { %v642_v6 = vadd.f32 %v641_v5, %v640_v4 }
 0x203   : > { %v643_v7 = vrot.slane %v642_v6, 2 }
 0x205   : > { %v644_v8 = vadd.f32 %v643_v7, %v642_v6 }
 0x207   : > { %v645_v9 = vrot.slane %v644_v8, 1 }
 0x209   : > { %v646_v10 = vadd.f32 %v645_v9, %v644_v8 }
 0x20b   : > { %932 = vrcp.f32 %v646_v10 }
 0x215   : > { %v933_v15 = vpop.eup %932 }
 0x216   : > { %v648_v16 = vmul.f32 %v933_v15, %v412_v13 }
 0x218   : > { %v653_v17 = vrot.slane %v648_v16, %v652_v14 }
 0x21a   : > { %v656_v18 = vmul.f32 %v929_v61, %v653_v17  ;;  %v655_v19 = vmul.f32 %v925_v58, %v653_v17  ;;  %v657_v20 = vmul.f32 %v927_v59, %v653_v17  ;;  %v658_v21 = vmul.f32 %v931_v63, %v653_v17 }
 0x21c   : > { %v662_v22 = vsel %vm608_vm4, %v656_v18, 0.0  ;;  %v659_v23 = vsel %vm608_vm4, %v655_v19, 0.0  ;;  %v665_v24 = vsel %vm608_vm4, %v657_v20, 0.0  ;;  %v668_v25 = vsel %vm608_vm4, %v658_v21, 0.0 }
 0x21d   : > { %663 = vadd.xlane.f32.xlu1 %v662_v22  ;;  %660 = vadd.xlane.f32.xlu0 %v659_v23 }
 0x221   : > { %666 = vadd.xlane.f32.xlu0 %v665_v24 }
 0x225   : > { %669 = vadd.xlane.f32.xlu0 %v668_v25 }
 0x2aa   : > { %v661_v29 = vpop.xlane.xlu0 %660  ;;  %v664_v33 = vpop.xlane.xlu1 %663 }
 0x2ab   : > { %v685_v36 = vrot.slane %v664_v33, %v684_v30  ;;  %v680_v37 = vrot.slane %v661_v29, %v679_v31 }
 0x2ad   : > { %v687_v41 = vsel %vm686_vm5, %v685_v36, %v680_v37 }
 0x2ae   : > { %v667_v35 = vpop.xlane.xlu0 %666 }
 0x2af   : > { %v692_v39 = vrot.slane %v667_v35, %v691_v34 }
 0x2b1   : > { %v694_v43 = vsel %vm693_vm6, %v692_v39, %v687_v41 }
 0x2b2   : > { %v670_v40 = vpop.xlane.xlu0 %669 }
 0x2b3   : > { %v699_v42 = vrot.slane %v670_v40, %v698_v38 }
 0x2b5   : > { %v701_v44 = vsel %vm700_vm7, %v699_v42, %v694_v43 }
 0x2b6   : > { %704 = vst.msk [vmem:[%s282_s26] sm:$0x1] %vm703_vm8, %v701_v44 }
 0x2b7   : > { %947 = shalt.err (!%p944_p3)
}
 0x2b8   : > { %s948_s16 = scalar_lea.hbm %s1141_s10, 16  ;;  %s952_s19 = scalar_lea.hbm %s1189_s6, 32 }
 0x2b9   : > { %p949_p4 = scmp.ne.s32.totalorder %s1141_s10, %s948_s16  ;;  %p953_p9 = scmp.lt.u32.totalorder %s1141_s10, %s1189_s6 }
 0x2ba   : > { %p954_p10 = scmp.lt.u32.totalorder %s952_s19, %s948_s16  ;;  %p956_p12 = scmp.lt.u32.totalorder %s948_s16, %s1141_s10 }
 0x2bb   : > { %p950_p7 = pnand %p949_p4, %p1076_p5 }
 0x2bc   : > { %p955_p11 = por %p954_p10, %p953_p9 }
 0x2bd   : > { %p951_p8 = pneg %p950_p7 }
 0x2be   : > { %p957_p13 = por %p956_p12, %p955_p11 }
 0x2c0   : > { %p958_p0 = pnand %p957_p13, %p951_p8 }
 0x2c2   : > { %961 = shalt.err (!%p958_p0)
}
 0x2c3   : > { %879 = dma.vmem_to_hbm [thread:$0]  (%p1076_p5), %s1143_s28, 16, %s1141_s10, %s706_s25  }
 0x2c4 PF: > { %p885_p1 = scmp.ge.s32.totalorder %s996_s24, 2  ;;  %s730_s26 = sand.u32 1, %s984_s21  }
 0x2c5   : > { %s731_s29 = scalar_lea.sflag [#allocation3], %s730_s26 }
 0x2c6   : > { %p882_p2 = pnand %p885_p1, %p1080_p6 }
 0x2c8   : > { %979 = dma.done.wait (!%p882_p2), %s731_s29, 16  }
 0x2c9   : > { %981 = vsyncadd (!%p882_p2), %s731_s29, 4294967280  ;;  %p16_p3 = scmp.ge.s32.totalorder %s1063_s27, 4   ;;  %s1192_s21 = smov %s988_s22 }
 0x2ca   : > { %s1193_s22 = smov %s992_s23  ;;  %s1194_s23 = smov %s1074_s30 }
 0x2cb   : > { %s1195_s24 = smov %s1063_s27  ;;  %18 = sbr.rel (!%p16_p3) target bundleno = 3 (0x3), region = 88 }
 0x2d2   :  { %735 = vsyncpa [#allocation3], 1 }
 0x2d3   :  { %737 = vsyncpa [#allocation3 + $0x1], 1 }

</bundles_post_ra>
